<compile_context>
chip_gen: v6e
topology: v6e:2x2x1
jax: 0.10.0
libtpu: 0.0.40
codegen_flags: <defaults>
</compile_context>

<pallas_src>
import jax
import jax.numpy as jnp
import numpy as np
from jax.experimental import pallas as pl
from jax.experimental.pallas import tpu as pltpu

LANE = 128


def _round_up(x, m):
    return ((x + m - 1) // m) * m


def _make_kernel(Bt, H, W, Cin, Cout, NPAD):
    """Build the per-tile kernel with static shape params closed over."""
    WCi = W * Cin
    WCo = W * Cout

    def kernel(xp_ref, wbig_ref, bconv_ref, wfc_ref, bfc_ref, out_ref):
        # xp_ref   : (Bt, H+2, (W+2)*Cin)  padded NHWC activations, channel fastest
        # wbig_ref : (9, W*Cin, W*Cout)    per-tap block-diagonal conv weights
        # bconv_ref: (1, W*Cout)           conv bias tiled over x
        # wfc_ref  : (W*Cout, NPAD)        FC weights with avg-pool (1/HW) folded in
        # bfc_ref  : (1, NPAD)             FC bias (zero-padded to 128 lanes)
        # out_ref  : (Bt, NPAD)            lane-dense logits
        xp = xp_ref[...]                                  # single VMEM load

        # 3x3 conv as 9 shifted, lane-dense matmuls accumulated in f32.
        h = None
        for t in range(9):
            dy, dx = t // 3, t % 3
            tap = xp[:, dy:dy + H, dx * Cin:dx * Cin + WCi]    # (Bt, H, W*Cin)
            tap2 = tap.reshape(Bt * H, WCi)                    # lane dim unchanged
            part = jnp.dot(tap2, wbig_ref[t],
                           preferred_element_type=jnp.float32)  # (Bt*H, W*Cout)
            h = part if h is None else h + part

        # bias + ReLU on a lane-dense (Bt*H, W*Cout) tile (VPU)
        h = jnp.maximum(h + bconv_ref[...], 0.0)

        # Global average pool folded into the classifier matmul (MXU):
        # z[(b,y), n] = sum_{x,o} relu_h[(b,y), x*Cout+o] * w_fc[o,n] / (H*W)
        z = jnp.dot(h, wfc_ref[...], preferred_element_type=jnp.float32)
        z = z.reshape(Bt, H, NPAD)
        out_ref[...] = jnp.sum(z, axis=1) + bfc_ref[...]        # (Bt, NPAD)

    return kernel


def scripted2unscripted_forward(x_nchw, w_conv, b_conv, w_fc, b_fc):
    """Forward pass of Scripted2Unscripted(pretrained) with a single Pallas kernel.

    x_nchw : [B, Cin, H, W] float32 (PyTorch NCHW)
    w_conv : [Cout, Cin, 3, 3], b_conv: [Cout]
    w_fc   : [Ncls, Cout],      b_fc  : [Ncls]
    returns: [B, Ncls] float32 logits
    """
    B, Cin, H, W = x_nchw.shape
    Cout = w_conv.shape[0]
    Ncls = w_fc.shape[0]
    HW = H * W
    WCi, WCo = W * Cin, W * Cout
    NPAD = _round_up(max(Ncls, LANE), LANE)

    # ---- batch tiling -------------------------------------------------------
    # Whole batch per grid step when small; for larger batches use tiles of 32
    # (multiple of 8 sublanes, >= 2 grid tiles so both v7x TensorCores get work).
    # Double-buffered input tile = Bt*(H+2)*(W+2)*Cin*4*2 bytes (~330 KB at
    # Bt=32, H=W=16), far below the v7x 64 MiB VMEM budget.
    if B <= 32:
        Bt = B
    else:
        Bt = 32
    Bp = _round_up(B, Bt)
    grid = (Bp // Bt,)

    # ---- activations: padded NHWC, channel fastest on the lane axis ---------
    x_nhwc = jnp.transpose(x_nchw, (0, 2, 3, 1)).astype(jnp.float32)
    x_sp = jnp.pad(x_nhwc, ((0, Bp - B), (1, 1), (1, 1), (0, 0)))
    xp = x_sp.reshape(Bp, H + 2, (W + 2) * Cin)

    # ---- conv weights: per-tap block-diagonal matmul operands ---------------
    # w_taps[dy, dx, c, o] = w_conv[o, c, dy, dx]; W_big_t = kron(I_W, w_t)
    w_taps = jnp.transpose(w_conv, (2, 3, 1, 0)).astype(jnp.float32)  # (3,3,Cin,Cout)
    eye_w = jnp.eye(W, dtype=jnp.float32)
    wbig = jnp.stack([jnp.kron(eye_w, w_taps[dy, dx])
                      for dy in range(3) for dx in range(3)], axis=0)  # (9, WCi, WCo)
    bconv_big = jnp.tile(b_conv.astype(jnp.float32), (W,)).reshape(1, WCo)

    # ---- FC with the average pool folded in, lane-padded to 128 -------------
    w_fc_m = jnp.transpose(w_fc, (1, 0)).astype(jnp.float32) / float(HW)   # (Cout,Ncls)
    w_fc_pad = jnp.pad(w_fc_m, ((0, 0), (0, NPAD - Ncls)))                 # (Cout,NPAD)
    w_fc_big = jnp.tile(w_fc_pad, (W, 1))                                  # (WCo,NPAD)
    b_fc_pad = jnp.pad(b_fc.astype(jnp.float32), (0, NPAD - Ncls)).reshape(1, NPAD)

    kernel = _make_kernel(Bt, H, W, Cin, Cout, NPAD)

    out = pl.pallas_call(
        kernel,
        out_shape=jax.ShapeDtypeStruct((Bp, NPAD), jnp.float32),
        grid_spec=pltpu.PrefetchScalarGridSpec(
            num_scalar_prefetch=0,
            grid=grid,
            in_specs=[
                pl.BlockSpec((Bt, H + 2, (W + 2) * Cin), lambda b: (b, 0, 0)),
                pl.BlockSpec((9, WCi, WCo), lambda b: (0, 0, 0)),   # resident
                pl.BlockSpec((1, WCo), lambda b: (0, 0)),           # resident
                pl.BlockSpec((WCo, NPAD), lambda b: (0, 0)),        # resident
                pl.BlockSpec((1, NPAD), lambda b: (0, 0)),          # resident
            ],
            out_specs=pl.BlockSpec((Bt, NPAD), lambda b: (b, 0)),
        ),
        compiler_params=pltpu.CompilerParams(
            dimension_semantics=("parallel",)),
    )(xp, wbig, bconv_big, w_fc_big, b_fc_pad)

    return out[:B, :Ncls]


def _reference_forward(x_nchw, w_conv, b_conv, w_fc, b_fc):
    """Pure-JAX reference (same math, no Pallas) for a correctness check."""
    B, Cin, H, W = x_nchw.shape
    x_nhwc = jnp.transpose(x_nchw, (0, 2, 3, 1))
    x_pad = jnp.pad(x_nhwc, ((0, 0), (1, 1), (1, 1), (0, 0)))
    patches = []
    for dy in range(3):
        for dx in range(3):
            patches.append(x_pad[:, dy:dy + H, dx:dx + W, :])
    x_col = jnp.concatenate(patches, axis=-1).reshape(B, H * W, 9 * Cin)
    w_col = jnp.transpose(w_conv, (2, 3, 1, 0)).reshape(9 * Cin, -1)
    h = jnp.maximum(jnp.einsum("bpk,kc->bpc", x_col, w_col) + b_conv, 0.0)
    pooled = jnp.mean(h, axis=1)
    return pooled @ w_fc.T + b_fc


if __name__ == "__main__":
    # Small shapes consistent with the wrapped model: batch=2, Cin=4, 16x16.
    B, Cin, H, W = 2, 4, 16, 16
    Cout, Ncls = 8, 10

    key = jax.random.PRNGKey(0)
    kx, kwc, kbc, kwf, kbf = jax.random.split(key, 5)

    x = jax.random.normal(kx, (B, Cin, H, W), dtype=jnp.float32)

    # Deterministic synthetic "pretrained" parameters (PyTorch layouts).
    w_conv = 0.1 * jax.random.normal(kwc, (Cout, Cin, 3, 3), dtype=jnp.float32)
    b_conv = 0.1 * jax.random.normal(kbc, (Cout,), dtype=jnp.float32)
    w_fc = 0.1 * jax.random.normal(kwf, (Ncls, Cout), dtype=jnp.float32)
    b_fc = 0.1 * jax.random.normal(kbf, (Ncls,), dtype=jnp.float32)

    logits = scripted2unscripted_forward(x, w_conv, b_conv, w_fc, b_fc)
    logits = jax.block_until_ready(logits)

    ref = jax.block_until_ready(_reference_forward(x, w_conv, b_conv, w_fc, b_fc))
    # Tolerance covers MXU default-precision operand rounding differences
    # between the folded-pool formulation and the pool-then-matmul reference.
    np.testing.assert_allclose(np.asarray(logits), np.asarray(ref),
                               rtol=2e-3, atol=2e-3)

    print("KERNEL_OK")
</pallas_src>

<mosaic_0001>
module attributes {stable_mosaic.version = 11 : i64} {
  func.func @kernel(%arg0: i32, %arg1: memref<2x18x72xf32, #tpu.memory_space<vmem>>, %arg2: memref<9x64x128xf32, #tpu.memory_space<vmem>>, %arg3: memref<1x128xf32, #tpu.memory_space<vmem>>, %arg4: memref<128x128xf32, #tpu.memory_space<vmem>>, %arg5: memref<1x128xf32, #tpu.memory_space<vmem>>, %arg6: memref<2x128xf32, #tpu.memory_space<vmem>>) attributes {dimension_semantics = [#tpu.dimension_semantics<parallel>], iteration_bounds = array<i64: 1>, scalar_prefetch = 0 : i64, scratch_operands = 0 : i64, tpu.core_type = #tpu.core_type<tc>, window_params = [{transform_indices = @transform_0, window_bounds = array<i64: 2, 18, 72>}, {pipeline_mode = #tpu.pipeline_mode<synchronous>, transform_indices = @transform_1, window_bounds = array<i64: 9, 64, 128>}, {pipeline_mode = #tpu.pipeline_mode<synchronous>, transform_indices = @transform_2, window_bounds = array<i64: 1, 128>}, {pipeline_mode = #tpu.pipeline_mode<synchronous>, transform_indices = @transform_3, window_bounds = array<i64: 128, 128>}, {pipeline_mode = #tpu.pipeline_mode<synchronous>, transform_indices = @transform_4, window_bounds = array<i64: 1, 128>}, {transform_indices = @transform_5, window_bounds = array<i64: 2, 128>}]} {
    %c0 = arith.constant 0 : index
    %c0_0 = arith.constant 0 : index
    %c0_1 = arith.constant 0 : index
    %0 = vector.load %arg1[%c0, %c0_0, %c0_1] : memref<2x18x72xf32, #tpu.memory_space<vmem>>, vector<2x18x72xf32>
    %1 = vector.extract_strided_slice %0 {offsets = [0, 0, 0], sizes = [2, 16, 64], strides = [1, 1, 1]} : vector<2x18x72xf32> to vector<2x16x64xf32>
    %2 = vector.shape_cast %1 : vector<2x16x64xf32> to vector<32x64xf32>
    %c0_2 = arith.constant 0 : index
    %c0_3 = arith.constant 0 : index
    %c0_4 = arith.constant 0 : index
    %3 = vector.load %arg2[%c0_2, %c0_3, %c0_4] : memref<9x64x128xf32, #tpu.memory_space<vmem>>, vector<1x64x128xf32>
    %4 = vector.shape_cast %3 : vector<1x64x128xf32> to vector<64x128xf32>
    %cst = arith.constant dense<0.000000e+00> : vector<32x128xf32>
    %5 = tpu.matmul %2, %4, %cst {dimension_numbers = #tpu.dot_dimension_numbers<[1], [0], [0], [1], [0, 0, 1, 1], [], []>} : vector<32x64xf32>, vector<64x128xf32>, vector<32x128xf32> -> vector<32x128xf32>
    %6 = vector.extract_strided_slice %0 {offsets = [0, 0, 4], sizes = [2, 16, 64], strides = [1, 1, 1]} : vector<2x18x72xf32> to vector<2x16x64xf32>
    %7 = vector.shape_cast %6 : vector<2x16x64xf32> to vector<32x64xf32>
    %c1 = arith.constant 1 : index
    %c0_5 = arith.constant 0 : index
    %c0_6 = arith.constant 0 : index
    %8 = vector.load %arg2[%c1, %c0_5, %c0_6] : memref<9x64x128xf32, #tpu.memory_space<vmem>>, vector<1x64x128xf32>
    %9 = vector.shape_cast %8 : vector<1x64x128xf32> to vector<64x128xf32>
    %cst_7 = arith.constant dense<0.000000e+00> : vector<32x128xf32>
    %10 = tpu.matmul %7, %9, %cst_7 {dimension_numbers = #tpu.dot_dimension_numbers<[1], [0], [0], [1], [0, 0, 1, 1], [], []>} : vector<32x64xf32>, vector<64x128xf32>, vector<32x128xf32> -> vector<32x128xf32>
    %11 = arith.addf %5, %10 : vector<32x128xf32>
    %12 = vector.extract_strided_slice %0 {offsets = [0, 0, 8], sizes = [2, 16, 64], strides = [1, 1, 1]} : vector<2x18x72xf32> to vector<2x16x64xf32>
    %13 = vector.shape_cast %12 : vector<2x16x64xf32> to vector<32x64xf32>
    %c2 = arith.constant 2 : index
    %c0_8 = arith.constant 0 : index
    %c0_9 = arith.constant 0 : index
    %14 = vector.load %arg2[%c2, %c0_8, %c0_9] : memref<9x64x128xf32, #tpu.memory_space<vmem>>, vector<1x64x128xf32>
    %15 = vector.shape_cast %14 : vector<1x64x128xf32> to vector<64x128xf32>
    %cst_10 = arith.constant dense<0.000000e+00> : vector<32x128xf32>
    %16 = tpu.matmul %13, %15, %cst_10 {dimension_numbers = #tpu.dot_dimension_numbers<[1], [0], [0], [1], [0, 0, 1, 1], [], []>} : vector<32x64xf32>, vector<64x128xf32>, vector<32x128xf32> -> vector<32x128xf32>
    %17 = arith.addf %11, %16 : vector<32x128xf32>
    %18 = vector.extract_strided_slice %0 {offsets = [0, 1, 0], sizes = [2, 16, 64], strides = [1, 1, 1]} : vector<2x18x72xf32> to vector<2x16x64xf32>
    %19 = vector.shape_cast %18 : vector<2x16x64xf32> to vector<32x64xf32>
    %c3 = arith.constant 3 : index
    %c0_11 = arith.constant 0 : index
    %c0_12 = arith.constant 0 : index
    %20 = vector.load %arg2[%c3, %c0_11, %c0_12] : memref<9x64x128xf32, #tpu.memory_space<vmem>>, vector<1x64x128xf32>
    %21 = vector.shape_cast %20 : vector<1x64x128xf32> to vector<64x128xf32>
    %cst_13 = arith.constant dense<0.000000e+00> : vector<32x128xf32>
    %22 = tpu.matmul %19, %21, %cst_13 {dimension_numbers = #tpu.dot_dimension_numbers<[1], [0], [0], [1], [0, 0, 1, 1], [], []>} : vector<32x64xf32>, vector<64x128xf32>, vector<32x128xf32> -> vector<32x128xf32>
    %23 = arith.addf %17, %22 : vector<32x128xf32>
    %24 = vector.extract_strided_slice %0 {offsets = [0, 1, 4], sizes = [2, 16, 64], strides = [1, 1, 1]} : vector<2x18x72xf32> to vector<2x16x64xf32>
    %25 = vector.shape_cast %24 : vector<2x16x64xf32> to vector<32x64xf32>
    %c4 = arith.constant 4 : index
    %c0_14 = arith.constant 0 : index
    %c0_15 = arith.constant 0 : index
    %26 = vector.load %arg2[%c4, %c0_14, %c0_15] : memref<9x64x128xf32, #tpu.memory_space<vmem>>, vector<1x64x128xf32>
    %27 = vector.shape_cast %26 : vector<1x64x128xf32> to vector<64x128xf32>
    %cst_16 = arith.constant dense<0.000000e+00> : vector<32x128xf32>
    %28 = tpu.matmul %25, %27, %cst_16 {dimension_numbers = #tpu.dot_dimension_numbers<[1], [0], [0], [1], [0, 0, 1, 1], [], []>} : vector<32x64xf32>, vector<64x128xf32>, vector<32x128xf32> -> vector<32x128xf32>
    %29 = arith.addf %23, %28 : vector<32x128xf32>
    %30 = vector.extract_strided_slice %0 {offsets = [0, 1, 8], sizes = [2, 16, 64], strides = [1, 1, 1]} : vector<2x18x72xf32> to vector<2x16x64xf32>
    %31 = vector.shape_cast %30 : vector<2x16x64xf32> to vector<32x64xf32>
    %c5 = arith.constant 5 : index
    %c0_17 = arith.constant 0 : index
    %c0_18 = arith.constant 0 : index
    %32 = vector.load %arg2[%c5, %c0_17, %c0_18] : memref<9x64x128xf32, #tpu.memory_space<vmem>>, vector<1x64x128xf32>
    %33 = vector.shape_cast %32 : vector<1x64x128xf32> to vector<64x128xf32>
    %cst_19 = arith.constant dense<0.000000e+00> : vector<32x128xf32>
    %34 = tpu.matmul %31, %33, %cst_19 {dimension_numbers = #tpu.dot_dimension_numbers<[1], [0], [0], [1], [0, 0, 1, 1], [], []>} : vector<32x64xf32>, vector<64x128xf32>, vector<32x128xf32> -> vector<32x128xf32>
    %35 = arith.addf %29, %34 : vector<32x128xf32>
    %36 = vector.extract_strided_slice %0 {offsets = [0, 2, 0], sizes = [2, 16, 64], strides = [1, 1, 1]} : vector<2x18x72xf32> to vector<2x16x64xf32>
    %37 = vector.shape_cast %36 : vector<2x16x64xf32> to vector<32x64xf32>
    %c6 = arith.constant 6 : index
    %c0_20 = arith.constant 0 : index
    %c0_21 = arith.constant 0 : index
    %38 = vector.load %arg2[%c6, %c0_20, %c0_21] : memref<9x64x128xf32, #tpu.memory_space<vmem>>, vector<1x64x128xf32>
    %39 = vector.shape_cast %38 : vector<1x64x128xf32> to vector<64x128xf32>
    %cst_22 = arith.constant dense<0.000000e+00> : vector<32x128xf32>
    %40 = tpu.matmul %37, %39, %cst_22 {dimension_numbers = #tpu.dot_dimension_numbers<[1], [0], [0], [1], [0, 0, 1, 1], [], []>} : vector<32x64xf32>, vector<64x128xf32>, vector<32x128xf32> -> vector<32x128xf32>
    %41 = arith.addf %35, %40 : vector<32x128xf32>
    %42 = vector.extract_strided_slice %0 {offsets = [0, 2, 4], sizes = [2, 16, 64], strides = [1, 1, 1]} : vector<2x18x72xf32> to vector<2x16x64xf32>
    %43 = vector.shape_cast %42 : vector<2x16x64xf32> to vector<32x64xf32>
    %c7 = arith.constant 7 : index
    %c0_23 = arith.constant 0 : index
    %c0_24 = arith.constant 0 : index
    %44 = vector.load %arg2[%c7, %c0_23, %c0_24] : memref<9x64x128xf32, #tpu.memory_space<vmem>>, vector<1x64x128xf32>
    %45 = vector.shape_cast %44 : vector<1x64x128xf32> to vector<64x128xf32>
    %cst_25 = arith.constant dense<0.000000e+00> : vector<32x128xf32>
    %46 = tpu.matmul %43, %45, %cst_25 {dimension_numbers = #tpu.dot_dimension_numbers<[1], [0], [0], [1], [0, 0, 1, 1], [], []>} : vector<32x64xf32>, vector<64x128xf32>, vector<32x128xf32> -> vector<32x128xf32>
    %47 = arith.addf %41, %46 : vector<32x128xf32>
    %48 = vector.extract_strided_slice %0 {offsets = [0, 2, 8], sizes = [2, 16, 64], strides = [1, 1, 1]} : vector<2x18x72xf32> to vector<2x16x64xf32>
    %49 = vector.shape_cast %48 : vector<2x16x64xf32> to vector<32x64xf32>
    %c8 = arith.constant 8 : index
    %c0_26 = arith.constant 0 : index
    %c0_27 = arith.constant 0 : index
    %50 = vector.load %arg2[%c8, %c0_26, %c0_27] : memref<9x64x128xf32, #tpu.memory_space<vmem>>, vector<1x64x128xf32>
    %51 = vector.shape_cast %50 : vector<1x64x128xf32> to vector<64x128xf32>
    %cst_28 = arith.constant dense<0.000000e+00> : vector<32x128xf32>
    %52 = tpu.matmul %49, %51, %cst_28 {dimension_numbers = #tpu.dot_dimension_numbers<[1], [0], [0], [1], [0, 0, 1, 1], [], []>} : vector<32x64xf32>, vector<64x128xf32>, vector<32x128xf32> -> vector<32x128xf32>
    %53 = arith.addf %47, %52 : vector<32x128xf32>
    %c0_29 = arith.constant 0 : index
    %c0_30 = arith.constant 0 : index
    %54 = vector.load %arg3[%c0_29, %c0_30] : memref<1x128xf32, #tpu.memory_space<vmem>>, vector<1x128xf32>
    %55 = vector.broadcast %54 : vector<1x128xf32> to vector<32x128xf32>
    %56 = arith.addf %53, %55 : vector<32x128xf32>
    %cst_31 = arith.constant 0.000000e+00 : f32
    %57 = vector.broadcast %cst_31 : f32 to vector<32x128xf32>
    %58 = arith.maximumf %56, %57 : vector<32x128xf32>
    %c0_32 = arith.constant 0 : index
    %c0_33 = arith.constant 0 : index
    %59 = vector.load %arg4[%c0_32, %c0_33] : memref<128x128xf32, #tpu.memory_space<vmem>>, vector<128x128xf32>
    %cst_34 = arith.constant dense<0.000000e+00> : vector<32x128xf32>
    %60 = tpu.matmul %58, %59, %cst_34 {dimension_numbers = #tpu.dot_dimension_numbers<[1], [0], [0], [1], [0, 0, 1, 1], [], []>} : vector<32x128xf32>, vector<128x128xf32>, vector<32x128xf32> -> vector<32x128xf32>
    %61 = vector.shape_cast %60 : vector<32x128xf32> to vector<2x16x128xf32>
    %cst_35 = arith.constant dense<0.000000e+00> : vector<2x128xf32>
    %62 = vector.multi_reduction <add>, %61, %cst_35 [1] : vector<2x16x128xf32> to vector<2x128xf32>
    %c0_36 = arith.constant 0 : index
    %c0_37 = arith.constant 0 : index
    %63 = vector.load %arg5[%c0_36, %c0_37] : memref<1x128xf32, #tpu.memory_space<vmem>>, vector<1x128xf32>
    %64 = vector.broadcast %63 : vector<1x128xf32> to vector<2x128xf32>
    %65 = arith.addf %62, %64 : vector<2x128xf32>
    %c0_38 = arith.constant 0 : index
    %c0_39 = arith.constant 0 : index
    %66 = vector.load %arg6[%c0_38, %c0_39] : memref<2x128xf32, #tpu.memory_space<vmem>>, vector<2x128xf32>
    tpu.vector_store %arg6[%c0_38, %c0_39], %65 {strides = array<i32>} : memref<2x128xf32, #tpu.memory_space<vmem>>, vector<2x128xf32>,
    return
  }
  func.func @transform_0(%arg0: i32) -> (i32, i32, i32) {
    %c0_i32 = arith.constant 0 : i32
    %c0_i32_0 = arith.constant 0 : i32
    %c0_i32_1 = arith.constant 0 : i32
    return %arg0, %c0_i32, %c0_i32_0 : i32, i32, i32
  }
  func.func @transform_1(%arg0: i32) -> (i32, i32, i32) {
    %c0_i32 = arith.constant 0 : i32
    %c0_i32_0 = arith.constant 0 : i32
    %c0_i32_1 = arith.constant 0 : i32
    %c0_i32_2 = arith.constant 0 : i32
    return %c0_i32, %c0_i32_0, %c0_i32_1 : i32, i32, i32
  }
  func.func @transform_2(%arg0: i32) -> (i32, i32) {
    %c0_i32 = arith.constant 0 : i32
    %c0_i32_0 = arith.constant 0 : i32
    %c0_i32_1 = arith.constant 0 : i32
    return %c0_i32, %c0_i32_0 : i32, i32
  }
  func.func @transform_3(%arg0: i32) -> (i32, i32) {
    %c0_i32 = arith.constant 0 : i32
    %c0_i32_0 = arith.constant 0 : i32
    %c0_i32_1 = arith.constant 0 : i32
    return %c0_i32, %c0_i32_0 : i32, i32
  }
  func.func @transform_4(%arg0: i32) -> (i32, i32) {
    %c0_i32 = arith.constant 0 : i32
    %c0_i32_0 = arith.constant 0 : i32
    %c0_i32_1 = arith.constant 0 : i32
    return %c0_i32, %c0_i32_0 : i32, i32
  }
  func.func @transform_5(%arg0: i32) -> (i32, i32) {
    %c0_i32 = arith.constant 0 : i32
    %c0_i32_0 = arith.constant 0 : i32
    return %arg0, %c0_i32 : i32, i32
  }
}

</mosaic_0001>

<bundles_post_ra>
// kernel: tpu_custom_call.1
= control target key start
LH: loop header
LB: loop body
LE: loop exit
PB: predicated region body
PF: predicated region fallthrough
CT: control target
= control target key end

     0   :  { %10 = vsyncpa [#allocation3], 0  ;;  %s1931_s0 = inlined_call_operand.vmem [shape: f32[2,18,72], index: 0, kind: input, shape index: {}]   ;;  %s1932_s1 = inlined_call_operand.hbm [shape: f32[9,64,128], index: 1, kind: input, shape index: {}]   ;;  %s1933_s2 = inlined_call_operand.vmem [shape: f32[1,128], index: 2, kind: input, shape index: {}]   ;;  %s1934_s3 = inlined_call_operand.hbm [shape: f32[128,128], index: 3, kind: input, shape index: {}]   ;;  %s1935_s4 = inlined_call_operand.vmem [shape: f32[1,128], index: 4, kind: input, shape index: {}]   ;;  %s1936_s5 = inlined_call_operand.hbm [shape: f32[2,128], index: 5, kind: output, shape index: {}]  }
   0x1   :  { %11 = vsyncpa [#allocation6], 0 }
   0x2   :  { %12 = vsyncpa [#allocation4], 0  ;;  %s1714_s18 = smov [#allocation2]  }
   0x3   :  { %s20_s19 = sshll.u32 %s1714_s18, 4  ;;  %s21_s19 = int_to_ptr.vmem [resolvable:$true] %s20_s19 }
   0x4   :  { %s1656_s20 = scalar_lea.vmem %s21_s19, 9216  ;;  %p1661_p1 = scmp.lt.s32.totalorder %s21_s19, %s21_s19 }
   0x5   :  { %p1657_p0 = scmp.ne.s32.totalorder %s21_s19, %s1656_s20  ;;  %p1662_p2 = scmp.lt.s32.totalorder %s1656_s20, %s1656_s20 }
   0x7   :  { %p1663_p3 = por %p1662_p2, %p1661_p1 }
   0x9   :  { %p1664_p4 = pnand %p1663_p3, %p1657_p0 }
   0xb   :  { %1667 = shalt.err (!%p1664_p4)
}
   0xc   :  { %s1715_s21 = smov 128   ;;  %s1716_s22 = smov 8  }
   0xd   :  { %26 = dma.hbm_to_vmem [thread:$0]  %s1932_s1, 9216, %s21_s19, [#allocation3], %s1715_s21, %s1715_s21, %s1716_s22  }
   0xe   :  { %s1717_s25 = smov [#allocation5]  }
   0xf   :  { %s34_s26 = sshll.u32 %s1717_s25, 4  ;;  %s35_s26 = int_to_ptr.vmem [resolvable:$true] %s34_s26 }
  0x10   :  { %s1676_s27 = scalar_lea.vmem %s35_s26, 2048  ;;  %p1681_p6 = scmp.lt.s32.totalorder %s35_s26, %s35_s26 }
  0x11   :  { %p1677_p5 = scmp.ne.s32.totalorder %s35_s26, %s1676_s27  ;;  %p1682_p7 = scmp.lt.s32.totalorder %s1676_s27, %s1676_s27 }
  0x13   :  { %p1683_p8 = por %p1682_p7, %p1681_p6 }
  0x15   :  { %p1684_p9 = pnand %p1683_p8, %p1677_p5 }
  0x17   :  { %1687 = shalt.err (!%p1684_p9)
}
  0x18   :  { %40 = dma.hbm_to_vmem [thread:$0]  %s1934_s3, 2048, %s35_s26, [#allocation6], %s1715_s21, %s1715_s21, %s1716_s22  }
  0x19   :  { %1708 = dma.done.wait [#allocation3], 9216  }
  0x1a   :  { %1709 = vsyncadd [#allocation3], 4294958080 }
  0x1b   :  { %1710 = dma.done.wait [#allocation6], 2048  }
  0x1c   :  { %1711 = vsyncadd [#allocation6], 4294965248  ;;  %v1760_v0 = vld [vmem:[%s1931_s0] sm:$0xff]  ;;  %v1765_v1 = vld [vmem:[%s1931_s0 + $0x18] sm:$0xff]  ;;  %s1718_s8 = smov 124   ;;  %vm84_vm0 = vcmask 523264  }
  0x1d   :  { %76 = vrot.lane.b32.xlu0 %v1760_v0, %s1718_s8  ;;  %80 = vrot.lane.b32.xlu1 %v1765_v1, %s1718_s8  ;;  %v1774_v2 = vld [vmem:[%s1931_s0 + $0x8] sm:$0xff]  ;;  %v1779_v3 = vld [vmem:[%s1931_s0 + $0x20] sm:$0xff]  ;;  %v71_v4 = vld [vmem:[#allocation2 + $0x78] sm:$0xff]  ;;  %s1719_s14 = smov 120   ;;  %v388_v13 = vrot.slane %v1760_v0, 1  ;;  %vm387_vm1 = vcmask 1046528  }
  0x1e   :  { %1443 = vmatprep.mubr.msk.f32.mxu1 %vm84_vm0, %v1760_v0  ;;  %v62_v5 = vld [vmem:[#allocation2 + $0x38] sm:$0xff]  ;;  %1405 = vmatprep.subr.mxu0 %v71_v4  ;;  %v70_v6 = vld [vmem:[#allocation2 + $0x70] sm:$0xff]  ;;  %v69_v9 = vld [vmem:[#allocation2 + $0x68] sm:$0xff]  ;;  %v389_v14 = vrot.slane %v1774_v2, 1  ;;  %v393_v19 = vrot.slane %v1765_v1, 1  ;;  %v394_v22 = vrot.slane %v1779_v3, 1 }
  0x1f   :  { %1427 = vmatprep.subr.mxu1 %v62_v5  ;;  %v61_v7 = vld [vmem:[#allocation2 + $0x30] sm:$0xff]  ;;  %1406 = vmatpush3.msra.mxu0 %v71_v4  ;;  %v60_v10 = vld [vmem:[#allocation2 + $0x28] sm:$0xff]  ;;  %v68_v11 = vld [vmem:[#allocation2 + $0x60] sm:$0xff]  ;;  %v733_v34 = vrot.slane %v1760_v0, 2  ;;  %v734_v35 = vrot.slane %v1774_v2, 2  ;;  %vm732_vm2 = vcmask 1045504  }
  0x20   :  { %1428 = vmatpush3.msra.mxu1 %v62_v5  ;;  %v1790_v8 = vld [vmem:[%s1931_s0 + $0x10] sm:$0x3]  ;;  %1407 = vmatprep.subr.mxu0 %v70_v6  ;;  %v59_v12 = vld [vmem:[#allocation2 + $0x20] sm:$0xff]  ;;  %v1802_v16 = vld [vmem:[%s1931_s0 + $0x28] sm:$0x3]  ;;  %v390_v20 = vsel %vm387_vm1, %v388_v13, %v389_v14  ;;  %v1819_v28 = vsel %vm387_vm1, %v393_v19, %v394_v22  ;;  %v738_v42 = vrot.slane %v1765_v1, 2 }
  0x21   :  { %78 = vrot.lane.b32.xlu0 %v1774_v2, %s1718_s8  ;;  %82 = vrot.lane.b32.xlu1 %v1779_v3, %s1718_s8  ;;  %v391_v15 = vrot.slane %v1790_v8, 1  ;;  %v67_v17 = vld [vmem:[#allocation2 + $0x58] sm:$0xff]  ;;  %v396_v23 = vrot.slane %v1802_v16, 1  ;;  %v66_v24 = vld [vmem:[#allocation2 + $0x50] sm:$0xff]  ;;  %v65_v26 = vld [vmem:[#allocation2 + $0x48] sm:$0xff]  ;;  %v736_v36 = vrot.slane %v1790_v8, 2  ;;  %v1846_v39 = vsel %vm732_vm2, %v733_v34, %v734_v35 }
  0x22   :  { %1429 = vmatprep.subr.mxu1 %v61_v7  ;;  %1408 = vmatpush3.msra.mxu0 %v70_v6  ;;  %v58_v18 = vld [vmem:[#allocation2 + $0x18] sm:$0xff]  ;;  %v57_v25 = vld [vmem:[#allocation2 + $0x10] sm:$0xff]  ;;  %v56_v27 = vld [vmem:[#allocation2 + $0x8] sm:$0xff]  ;;  %v739_v43 = vrot.slane %v1779_v3, 2  ;;  %v741_v44 = vrot.slane %v1802_v16, 2  ;;  %s1720_s19 = smov [#allocation7]  }
  0x23   :  { %1430 = vmatpush3.msra.mxu1 %v61_v7  ;;  %1409 = vmatprep.subr.mxu0 %v69_v9  ;;  %v1811_v21 = vsel %vm387_vm1, %v389_v14, %v391_v15  ;;  %v1822_v29 = vsel %vm387_vm1, %v394_v22, %v396_v23  ;;  %v64_v30 = vld [vmem:[#allocation2 + $0x40] sm:$0xff]  ;;  %v1828_v32 = vld [vmem:[#allocation2 + $0xb8] sm:$0xff]  ;;  %v405_v37 = vld [vmem:[#allocation2 + $0xf0] sm:$0xff]  ;;  %v1849_v40 = vsel %vm732_vm2, %v734_v35, %v736_v36  ;;  %s1229_s20 = sshll.u32 %s1720_s19, 4  ;;  %vm1219_vm3 = vcmask 1041409   ;;  %s1230_s20 = int_to_ptr.vmem [resolvable:$true] %s1229_s20 }
  0x24   :  { %1431 = vmatprep.subr.mxu1 %v60_v10  ;;  %1410 = vmatpush3.msra.mxu0 %v69_v9  ;;  %v55_v31 = vld [vmem:[#allocation2] sm:$0xff]  ;;  %v406_v33 = vld [vmem:[#allocation2 + $0xf8] sm:$0xff]  ;;  %v404_v38 = vld [vmem:[#allocation2 + $0xe8] sm:$0xff]  ;;  %v1866_v47 = vsel %vm732_vm2, %v738_v42, %v739_v43  ;;  %v1869_v48 = vsel %vm732_vm2, %v739_v43, %v741_v44  ;;  %s1688_s21 = scalar_lea.vmem %s1230_s20, 32  ;;  %p1693_p11 = scmp.lt.s32.totalorder %s1230_s20, %s1230_s20 }
  0x25   :  { %280 = vrot.lane.b32.xlu0 %v1760_v0, %s1719_s14  ;;  %282 = vrot.lane.b32.xlu1 %v1774_v2, %s1719_s14  ;;  %v403_v41 = vld [vmem:[#allocation2 + $0xe0] sm:$0xff]  ;;  %v402_v45 = vld [vmem:[#allocation2 + $0xd8] sm:$0xff]  ;;  %v401_v46 = vld [vmem:[#allocation2 + $0xd0] sm:$0xff]  ;;  %p1689_p10 = scmp.ne.s32.totalorder %s1230_s20, %s1688_s21  ;;  %p1694_p12 = scmp.lt.s32.totalorder %s1688_s21, %s1688_s21 }
  0x26   :  { %1432 = vmatpush3.msra.mxu1 %v60_v10  ;;  %1411 = vmatprep.subr.mxu0 %v68_v11  ;;  %v400_v49 = vld [vmem:[#allocation2 + $0xc8] sm:$0xff]  ;;  %v399_v50 = vld [vmem:[#allocation2 + $0xc0] sm:$0xff]  ;;  %v626_v51 = vld [vmem:[#allocation2 + $0x178] sm:$0xff] }
  0x27   :  { %1433 = vmatprep.subr.mxu1 %v59_v12  ;;  %1412 = vmatpush3.msra.mxu0 %v68_v11  ;;  %v625_v52 = vld [vmem:[#allocation2 + $0x170] sm:$0xff]  ;;  %v624_v53 = vld [vmem:[#allocation2 + $0x168] sm:$0xff]  ;;  %v623_v54 = vld [vmem:[#allocation2 + $0x160] sm:$0xff]  ;;  %p1695_p13 = por %p1694_p12, %p1693_p11 }
  0x28   :  { %1434 = vmatpush3.msra.mxu1 %v59_v12  ;;  %1413 = vmatprep.subr.mxu0 %v67_v17  ;;  %v622_v55 = vld [vmem:[#allocation2 + $0x158] sm:$0xff]  ;;  %v621_v56 = vld [vmem:[#allocation2 + $0x150] sm:$0xff]  ;;  %v620_v57 = vld [vmem:[#allocation2 + $0x148] sm:$0xff] }
  0x29   :  { %284 = vrot.lane.b32.xlu0 %v1765_v1, %s1719_s14  ;;  %286 = vrot.lane.b32.xlu1 %v1779_v3, %s1719_s14  ;;  %v619_v58 = vld [vmem:[#allocation2 + $0x140] sm:$0xff]  ;;  %v1885_v59 = vld [vmem:[#allocation2 + $0x1f8] sm:$0xff]  ;;  %v278_v63 = vld [vmem:[#allocation2 + $0xb0] sm:$0xff]  ;;  %p1696_p0 = pnand %p1695_p13, %p1689_p10 }
  0x2a   :  { %1435 = vmatprep.subr.mxu1 %v58_v18  ;;  %1414 = vmatpush3.msra.mxu0 %v67_v17  ;;  %v275_v5 = vld [vmem:[#allocation2 + $0x98] sm:$0xff]  ;;  %v274_v6 = vld [vmem:[#allocation2 + $0x90] sm:$0xff]  ;;  %v273_v9 = vld [vmem:[#allocation2 + $0x88] sm:$0xff] }
  0x2b   :  { %1436 = vmatpush3.msra.mxu1 %v58_v18  ;;  %1415 = vmatprep.subr.mxu0 %v66_v24  ;;  %v272_v10 = vld [vmem:[#allocation2 + $0x80] sm:$0xff]  ;;  %v512_v13 = vld [vmem:[#allocation2 + $0x138] sm:$0xff]  ;;  %v511_v14 = vld [vmem:[#allocation2 + $0x130] sm:$0xff] }
  0x2c   :  { %1437 = vmatprep.subr.mxu1 %v57_v25  ;;  %1416 = vmatpush3.msra.mxu0 %v66_v24  ;;  %v510_v17 = vld [vmem:[#allocation2 + $0x128] sm:$0xff]  ;;  %v509_v18 = vld [vmem:[#allocation2 + $0x120] sm:$0xff]  ;;  %v856_v22 = vld [vmem:[#allocation2 + $0x1f0] sm:$0xff] }
  0x2d   :  { %513 = vrot.lane.b32.xlu0 %v390_v20, %s1718_s8  ;;  %515 = vrot.lane.b32.xlu1 %v1811_v21, %s1718_s8  ;;  %v507_v23 = vld [vmem:[#allocation2 + $0x110] sm:$0xff]  ;;  %v749_v34 = vld [vmem:[#allocation2 + $0x1a8] sm:$0xff]  ;;  %v748_v35 = vld [vmem:[#allocation2 + $0x1a0] sm:$0xff] }
  0x2e   :  { %1438 = vmatpush3.msra.mxu1 %v57_v25  ;;  %1417 = vmatprep.subr.mxu0 %v65_v26  ;;  %v506_v25 = vld [vmem:[#allocation2 + $0x108] sm:$0xff]  ;;  %v852_v36 = vld [vmem:[#allocation2 + $0x1d0] sm:$0xff]  ;;  %v850_v44 = vld [vmem:[#allocation2 + $0x1c0] sm:$0xff] }
  0x2f   :  { %1439 = vmatprep.subr.mxu1 %v56_v27  ;;  %1418 = vmatpush3.msra.mxu0 %v65_v26  ;;  %v746_v43 = vld [vmem:[#allocation2 + $0x190] sm:$0xff] }
  0x30   :  { %1440 = vmatpush3.msra.mxu1 %v56_v27  ;;  %1419 = vmatprep.subr.mxu0 %v64_v30  ;;  %v855_v27 = vld [vmem:[#allocation2 + $0x1e8] sm:$0xff] }
  0x31   :  { %517 = vrot.lane.b32.xlu0 %v1819_v28, %s1718_s8  ;;  %519 = vrot.lane.b32.xlu1 %v1822_v29, %s1718_s8 }
  0x32   :  { %1441 = vmatprep.subr.mxu1 %v55_v31  ;;  %1420 = vmatpush3.msra.mxu0 %v64_v30  ;;  %v751_v30 = vld [vmem:[#allocation2 + $0x1b8] sm:$0xff] }
  0x33   :  { %1442 = vmatpush3.msra.mxu1 %v55_v31  ;;  %1449 = vmatprep.subr.mxu0 %v1828_v32  ;;  %v750_v31 = vld [vmem:[#allocation2 + $0x1b0] sm:$0xff] }
  0x34   :  { %1444 = vmatmul.mubr.msk.f32.vlgmr.msra.gmra.mxu1 %vm84_vm0, %v1774_v2  ;;  %1471 = vmatprep.subr.mxu1 %v406_v33  ;;  %v276_v2 = vld [vmem:[#allocation2 + $0xa0] sm:$0xff] }
  0x35   :  { %627 = vrot.lane.b32.xlu0 %v390_v20, %s1719_s14  ;;  %629 = vrot.lane.b32.xlu1 %v1811_v21, %s1719_s14 }
  0x36   :  { %1446 = vmatprep.mubr.msk.f32.mxu1 %vm84_vm0, %v1765_v1  ;;  %1472 = vmatpush3.msra.mxu1 %v406_v33  ;;  %v277_v1 = vld [vmem:[#allocation2 + $0xa8] sm:$0xff] }
  0x37   :  { %1473 = vmatprep.subr.mxu1 %v405_v37 }
  0x38   :  { %1447 = vmatmul.mubr.msk.f32.gmra.mxu1 %vm84_vm0, %v1779_v3 }
  0x39   :  { %631 = vrot.lane.b32.xlu0 %v1819_v28, %s1719_s14  ;;  %633 = vrot.lane.b32.xlu1 %v1822_v29, %s1719_s14 }
  0x3a   :  { %1474 = vmatpush3.msra.mxu1 %v405_v37  ;;  %1487 = vmatprep.mubr.msk.f32.mxu1 %vm84_vm0, %v390_v20 }
  0x3b   :  { %1475 = vmatprep.subr.mxu1 %v404_v38 }
  0x3c   :  { %1476 = vmatpush3.msra.mxu1 %v404_v38  ;;  %v747_v38 = vld [vmem:[#allocation2 + $0x198] sm:$0xff] }
  0x3d   :  { %858 = vrot.lane.b32.xlu0 %v1846_v39, %s1718_s8  ;;  %860 = vrot.lane.b32.xlu1 %v1849_v40, %s1718_s8 }
  0x3e   :  { %1477 = vmatprep.subr.mxu1 %v403_v41 }
  0x3f   :  { %1478 = vmatpush3.msra.mxu1 %v403_v41  ;;  %v851_v41 = vld [vmem:[#allocation2 + $0x1c8] sm:$0xff] }
  0x40   :  { %1479 = vmatprep.subr.mxu1 %v402_v45 }
  0x41   :  { %972 = vrot.lane.b32.xlu0 %v1846_v39, %s1719_s14  ;;  %974 = vrot.lane.b32.xlu1 %v1849_v40, %s1719_s14 }
  0x42   :  { %1480 = vmatpush3.msra.mxu1 %v402_v45  ;;  %v745_v45 = vld [vmem:[#allocation2 + $0x188] sm:$0xff] }
  0x43   :  { %1481 = vmatprep.subr.mxu1 %v401_v46 }
  0x44   :  { %1482 = vmatpush3.msra.mxu1 %v401_v46 }
  0x45   :  { %862 = vrot.lane.b32.xlu0 %v1866_v47, %s1718_s8  ;;  %864 = vrot.lane.b32.xlu1 %v1869_v48, %s1718_s8 }
  0x46   :  { %1483 = vmatprep.subr.mxu1 %v400_v49 }
  0x47   :  { %1484 = vmatpush3.msra.mxu1 %v400_v49  ;;  %v744_v49 = vld [vmem:[#allocation2 + $0x180] sm:$0xff] }
  0x48   :  { %1485 = vmatprep.subr.mxu1 %v399_v50 }
  0x49   :  { %976 = vrot.lane.b32.xlu0 %v1866_v47, %s1719_s14  ;;  %978 = vrot.lane.b32.xlu1 %v1869_v48, %s1719_s14 }
  0x4a   :  { %1486 = vmatpush3.msra.mxu1 %v399_v50 }
  0x4b   :  { %1488 = vmatmul.mubr.msk.f32.vlgmr.msra.gmra.mxu1 %vm84_vm0, %v1811_v21  ;;  %1515 = vmatprep.subr.mxu1 %v626_v51  ;;  %v508_v21 = vld [vmem:[#allocation2 + $0x118] sm:$0xff] }
  0x4c   :  { %1516 = vmatpush3.msra.mxu1 %v626_v51  ;;  %1490 = vmatprep.mubr.msk.f32.mxu1 %vm84_vm0, %v1819_v28  ;;  %v505_v28 = vld [vmem:[#allocation2 + $0x100] sm:$0xff]  ;;  %v971_v51 = vld [vmem:[#allocation2 + $0x238] sm:$0xff] }
  0x4d   :  { %1517 = vmatprep.subr.mxu1 %v625_v52 }
  0x4e   :  { %1518 = vmatpush3.msra.mxu1 %v625_v52  ;;  %v970_v52 = vld [vmem:[#allocation2 + $0x230] sm:$0xff] }
  0x4f   :  { %1491 = vmatmul.mubr.msk.f32.gmra.mxu1 %vm84_vm0, %v1822_v29  ;;  %1519 = vmatprep.subr.mxu1 %v624_v53  ;;  %v854_v29 = vld [vmem:[#allocation2 + $0x1e0] sm:$0xff] }
  0x50   :  { %1520 = vmatpush3.msra.mxu1 %v624_v53 }
  0x51   :  { %1521 = vmatprep.subr.mxu1 %v623_v54 }
  0x52   :  { %1522 = vmatpush3.msra.mxu1 %v623_v54  ;;  %v968_v54 = vld [vmem:[#allocation2 + $0x220] sm:$0xff] }
  0x53   :  { %1523 = vmatprep.subr.mxu1 %v622_v55 }
  0x54   :  { %1524 = vmatpush3.msra.mxu1 %v622_v55  ;;  %v967_v55 = vld [vmem:[#allocation2 + $0x218] sm:$0xff] }
  0x55   :  { %1525 = vmatprep.subr.mxu1 %v621_v56 }
  0x56   :  { %1526 = vmatpush3.msra.mxu1 %v621_v56  ;;  %v964_v56 = vld [vmem:[#allocation2 + $0x200] sm:$0xff] }
  0x57   :  { %1527 = vmatprep.subr.mxu1 %v620_v57 }
  0x58   :  { %1528 = vmatpush3.msra.mxu1 %v620_v57 }
  0x59   :  { %1529 = vmatprep.subr.mxu1 %v619_v58 }
  0x5a   :  { %1530 = vmatpush3.msra.mxu1 %v619_v58  ;;  %v1107_v58 = vld [vmem:[#allocation5 + $0x78] sm:$0xff] }
  0x5b   :  { %1559 = vmatprep.subr.mxu1 %v1885_v59 }
  0x8f   :  { %v77_v60 = vpop.permute.xlu0 %76  ;;  %v81_v61 = vpop.permute.xlu1 %80 }
  0x90   :  { %1421 = vmatprep.mubr.msk.f32.mxu0 %vm84_vm0, %v77_v60  ;;  %v1105_v60 = vld [vmem:[#allocation5 + $0x68] sm:$0xff] }
  0x93   :  { %v79_v62 = vpop.permute.xlu0 %78  ;;  %v83_v0 = vpop.permute.xlu1 %82 }
  0x94   :  { %1422 = vmatmul.mubr.msk.f32.vlgmr.msra.gmra.mxu0 %vm84_vm0, %v79_v62  ;;  %v1103_v62 = vld [vmem:[#allocation5 + $0x58] sm:$0xff] }
  0x95   :  { %1450 = vmatpush3.msra.mxu0 %v1828_v32  ;;  %1424 = vmatprep.mubr.msk.f32.mxu0 %vm84_vm0, %v81_v61  ;;  %v853_v32 = vld [vmem:[#allocation2 + $0x1d8] sm:$0xff]  ;;  %v1104_v61 = vld [vmem:[#allocation5 + $0x60] sm:$0xff] }
  0x96   :  { %1451 = vmatprep.subr.mxu0 %v278_v63 }
  0x97   :  { %1452 = vmatpush3.msra.mxu0 %v278_v63  ;;  %v281_v3 = vpop.permute.xlu0 %280  ;;  %v283_v4 = vpop.permute.xlu1 %282  ;;  %v1102_v63 = vld [vmem:[#allocation5 + $0x50] sm:$0xff] }
  0x98   :  { %1453 = vmatprep.subr.mxu0 %v277_v1  ;;  %1425 = vmatmul.mubr.msk.f32.gmra.mxu0 %vm84_vm0, %v83_v0  ;;  %v1101_v0 = vld [vmem:[#allocation5 + $0x48] sm:$0xff] }
  0x99   :  { %1454 = vmatpush3.msra.mxu0 %v277_v1  ;;  %1465 = vmatprep.mubr.msk.f32.mxu0 %vm84_vm0, %v281_v3  ;;  %v1100_v1 = vld [vmem:[#allocation5 + $0x40] sm:$0xff]  ;;  %v1098_v3 = vld [vmem:[#allocation5 + $0x30] sm:$0xff] }
  0x9a   :  { %1455 = vmatprep.subr.mxu0 %v276_v2 }
  0x9b   :  { %1456 = vmatpush3.msra.mxu0 %v276_v2  ;;  %v285_v7 = vpop.permute.xlu0 %284  ;;  %v287_v8 = vpop.permute.xlu1 %286  ;;  %v1099_v2 = vld [vmem:[#allocation5 + $0x38] sm:$0xff] }
  0x9c   :  { %1457 = vmatprep.subr.mxu0 %v275_v5 }
  0x9d   :  { %1458 = vmatpush3.msra.mxu0 %v275_v5  ;;  %v1096_v5 = vld [vmem:[#allocation5 + $0x20] sm:$0xff] }
  0x9e   :  { %1459 = vmatprep.subr.mxu0 %v274_v6 }
  0x9f   :  { %1460 = vmatpush3.msra.mxu0 %v274_v6  ;;  %v514_v11 = vpop.permute.xlu0 %513  ;;  %v516_v12 = vpop.permute.xlu1 %515  ;;  %v1095_v6 = vld [vmem:[#allocation5 + $0x18] sm:$0xff] }
  0xa0   :  { %1461 = vmatprep.subr.mxu0 %v273_v9 }
  0xa1   :  { %1462 = vmatpush3.msra.mxu0 %v273_v9  ;;  %v1092_v9 = vld [vmem:[#allocation5] sm:$0xff] }
  0xa2   :  { %1463 = vmatprep.subr.mxu0 %v272_v10 }
  0xa3   :  { %1464 = vmatpush3.msra.mxu0 %v272_v10  ;;  %v518_v15 = vpop.permute.xlu0 %517  ;;  %v520_v16 = vpop.permute.xlu1 %519 }
  0xa4   :  { %1466 = vmatmul.mubr.msk.f32.vlgmr.msra.gmra.mxu0 %vm84_vm0, %v283_v4  ;;  %1493 = vmatprep.subr.mxu0 %v512_v13  ;;  %v1097_v4 = vld [vmem:[#allocation5 + $0x28] sm:$0xff] }
  0xa5   :  { %1494 = vmatpush3.msra.mxu0 %v512_v13  ;;  %1468 = vmatprep.mubr.msk.f32.mxu0 %vm84_vm0, %v285_v7  ;;  %v1094_v7 = vld [vmem:[#allocation5 + $0x10] sm:$0xff] }
  0xa6   :  { %1495 = vmatprep.subr.mxu0 %v511_v14 }
  0xa7   :  { %1496 = vmatpush3.msra.mxu0 %v511_v14  ;;  %v628_v19 = vpop.permute.xlu0 %627  ;;  %v630_v20 = vpop.permute.xlu1 %629 }
  0xa8   :  { %1469 = vmatmul.mubr.msk.f32.gmra.mxu0 %vm84_vm0, %v287_v8  ;;  %1497 = vmatprep.subr.mxu0 %v510_v17  ;;  %v1093_v8 = vld [vmem:[#allocation5 + $0x8] sm:$0xff] }
  0xa9   :  { %1498 = vmatpush3.msra.mxu0 %v510_v17  ;;  %1509 = vmatprep.mubr.msk.f32.mxu0 %vm84_vm0, %v514_v11 }
  0xaa   :  { %1499 = vmatprep.subr.mxu0 %v509_v18  ;;  %1531 = vmatprep.mubr.msk.f32.mxu1 %vm84_vm0, %v628_v19 }
  0xab   :  { %1500 = vmatpush3.msra.mxu0 %v509_v18  ;;  %1532 = vmatmul.mubr.msk.f32.vlgmr.msra.gmra.mxu1 %vm84_vm0, %v630_v20  ;;  %v632_v24 = vpop.permute.xlu0 %631  ;;  %v634_v26 = vpop.permute.xlu1 %633 }
  0xac   :  { %1501 = vmatprep.subr.mxu0 %v508_v21  ;;  %1560 = vmatpush3.msra.mxu1 %v1885_v59  ;;  %v1106_v59 = vld [vmem:[#allocation5 + $0x70] sm:$0xff] }
  0xad   :  { %1502 = vmatpush3.msra.mxu0 %v508_v21  ;;  %1561 = vmatprep.subr.mxu1 %v856_v22 }
  0xae   :  { %1503 = vmatprep.subr.mxu0 %v507_v23  ;;  %1534 = vmatprep.mubr.msk.f32.mxu1 %vm84_vm0, %v632_v24 }
  0xaf   :  { %1504 = vmatpush3.msra.mxu0 %v507_v23  ;;  %1562 = vmatpush3.msra.mxu1 %v856_v22  ;;  %v859_v33 = vpop.permute.xlu0 %858  ;;  %v861_v37 = vpop.permute.xlu1 %860 }
  0xb0   :  { %1505 = vmatprep.subr.mxu0 %v506_v25  ;;  %1535 = vmatmul.mubr.msk.f32.gmra.mxu1 %vm84_vm0, %v634_v26 }
  0xb1   :  { %1506 = vmatpush3.msra.mxu0 %v506_v25  ;;  %1563 = vmatprep.subr.mxu1 %v855_v27 }
  0xb2   :  { %1507 = vmatprep.subr.mxu0 %v505_v28  ;;  %1564 = vmatpush3.msra.mxu1 %v855_v27 }
  0xb3   :  { %1508 = vmatpush3.msra.mxu0 %v505_v28  ;;  %1565 = vmatprep.subr.mxu1 %v854_v29  ;;  %v973_v42 = vpop.permute.xlu0 %972  ;;  %v975_v46 = vpop.permute.xlu1 %974 }
  0xb4   :  { %1510 = vmatmul.mubr.msk.f32.vlgmr.msra.gmra.mxu0 %vm84_vm0, %v516_v12  ;;  %1537 = vmatprep.subr.mxu0 %v751_v30 }
  0xb5   :  { %1538 = vmatpush3.msra.mxu0 %v751_v30  ;;  %1512 = vmatprep.mubr.msk.f32.mxu0 %vm84_vm0, %v518_v15 }
  0xb6   :  { %1539 = vmatprep.subr.mxu0 %v750_v31  ;;  %1566 = vmatpush3.msra.mxu1 %v854_v29 }
  0xb7   :  { %1540 = vmatpush3.msra.mxu0 %v750_v31  ;;  %1567 = vmatprep.subr.mxu1 %v853_v32  ;;  %v863_v50 = vpop.permute.xlu0 %862  ;;  %v865_v53 = vpop.permute.xlu1 %864 }
  0xb8   :  { %1513 = vmatmul.mubr.msk.f32.gmra.mxu0 %vm84_vm0, %v520_v16  ;;  %1541 = vmatprep.subr.mxu0 %v749_v34 }
  0xb9   :  { %1542 = vmatpush3.msra.mxu0 %v749_v34  ;;  %1568 = vmatpush3.msra.mxu1 %v853_v32 }
  0xba   :  { %1543 = vmatprep.subr.mxu0 %v748_v35  ;;  %1569 = vmatprep.subr.mxu1 %v852_v36 }
  0xbb   :  { %1544 = vmatpush3.msra.mxu0 %v748_v35  ;;  %1570 = vmatpush3.msra.mxu1 %v852_v36  ;;  %v977_v57 = vpop.permute.xlu0 %976 }
  0xbc   :  { %1545 = vmatprep.subr.mxu0 %v747_v38  ;;  %1571 = vmatprep.subr.mxu1 %v851_v41 }
  0xbd   :  { %1546 = vmatpush3.msra.mxu0 %v747_v38  ;;  %1553 = vmatprep.mubr.msk.f32.mxu0 %vm84_vm0, %v1846_v39  ;;  %v969_v39 = vld [vmem:[#allocation2 + $0x228] sm:$0xff] }
  0xbe   :  { %1547 = vmatprep.subr.mxu0 %v746_v43  ;;  %1572 = vmatpush3.msra.mxu1 %v851_v41 }
  0xbf   :  { %1548 = vmatpush3.msra.mxu0 %v746_v43  ;;  %1573 = vmatprep.subr.mxu1 %v850_v44 }
  0xc0   :  { %1549 = vmatprep.subr.mxu0 %v745_v45  ;;  %1574 = vmatpush3.msra.mxu1 %v850_v44 }
  0xc1   :  { %1550 = vmatpush3.msra.mxu0 %v745_v45  ;;  %1575 = vmatprep.mubr.msk.f32.mxu1 %vm84_vm0, %v859_v33 }
  0xc2   :  { %1551 = vmatprep.subr.mxu0 %v744_v49  ;;  %1576 = vmatmul.mubr.msk.f32.vlgmr.msra.gmra.mxu1 %vm84_vm0, %v861_v37 }
  0xc3   :  { %1552 = vmatpush3.msra.mxu0 %v744_v49  ;;  %1578 = vmatprep.mubr.msk.f32.mxu1 %vm84_vm0, %v863_v50 }
  0xc4   :  { %1554 = vmatmul.mubr.msk.f32.vlgmr.msra.gmra.mxu0 %vm84_vm0, %v1849_v40  ;;  %1581 = vmatprep.subr.mxu0 %v971_v51  ;;  %v966_v40 = vld [vmem:[#allocation2 + $0x210] sm:$0xff] }
  0xc5   :  { %1582 = vmatpush3.msra.mxu0 %v971_v51  ;;  %1556 = vmatprep.mubr.msk.f32.mxu0 %vm84_vm0, %v1866_v47  ;;  %v965_v47 = vld [vmem:[#allocation2 + $0x208] sm:$0xff] }
  0xc6   :  { %1583 = vmatprep.subr.mxu0 %v970_v52  ;;  %1579 = vmatmul.mubr.msk.f32.gmra.mxu1 %vm84_vm0, %v865_v53 }
  0xc7   :  { %1584 = vmatpush3.msra.mxu0 %v970_v52  ;;  %1603 = vmatprep.subr.mxu1 %v1107_v58 }
  0xc8   :  { %1557 = vmatmul.mubr.msk.f32.gmra.mxu0 %vm84_vm0, %v1869_v48  ;;  %1585 = vmatprep.subr.mxu0 %v969_v39  ;;  %v979_v48 = vpop.permute.xlu1 %978 }
  0xc9   :  { %1586 = vmatpush3.msra.mxu0 %v969_v39  ;;  %1597 = vmatprep.mubr.msk.f32.mxu0 %vm84_vm0, %v973_v42 }
  0xca   :  { %1587 = vmatprep.subr.mxu0 %v968_v54  ;;  %1604 = vmatpush3.msra.mxu1 %v1107_v58 }
  0xcb   :  { %1588 = vmatpush3.msra.mxu0 %v968_v54  ;;  %1605 = vmatprep.subr.mxu1 %v1106_v59 }
  0xcc   :  { %1589 = vmatprep.subr.mxu0 %v967_v55  ;;  %1606 = vmatpush3.msra.mxu1 %v1106_v59 }
  0xcd   :  { %1590 = vmatpush3.msra.mxu0 %v967_v55  ;;  %1607 = vmatprep.subr.mxu1 %v1105_v60 }
  0xce   :  { %1591 = vmatprep.subr.mxu0 %v966_v40  ;;  %1608 = vmatpush3.msra.mxu1 %v1105_v60 }
  0xcf   :  { %1592 = vmatpush3.msra.mxu0 %v966_v40  ;;  %1609 = vmatprep.subr.mxu1 %v1104_v61 }
  0xd0   :  { %1593 = vmatprep.subr.mxu0 %v965_v47  ;;  %1610 = vmatpush3.msra.mxu1 %v1104_v61 }
  0xd1   :  { %1594 = vmatpush3.msra.mxu0 %v965_v47  ;;  %1611 = vmatprep.subr.mxu1 %v1103_v62 }
  0xd2   :  { %1595 = vmatprep.subr.mxu0 %v964_v56  ;;  %1612 = vmatpush3.msra.mxu1 %v1103_v62 }
  0xd3   :  { %1596 = vmatpush3.msra.mxu0 %v964_v56  ;;  %1613 = vmatprep.subr.mxu1 %v1102_v63 }
  0xd4   :  { %1598 = vmatmul.mubr.msk.f32.vlgmr.msra.gmra.mxu0 %vm84_vm0, %v975_v46  ;;  %1614 = vmatpush3.msra.mxu1 %v1102_v63 }
  0xd5   :  { %1600 = vmatprep.mubr.msk.f32.mxu0 %vm84_vm0, %v977_v57  ;;  %1615 = vmatprep.subr.mxu1 %v1101_v0 }
  0xd6   :  { %1616 = vmatpush3.msra.mxu1 %v1101_v0 }
  0xd7   :  { %1617 = vmatprep.subr.mxu1 %v1100_v1 }
  0xd8   :  { %1601 = vmatmul.mubr.msk.f32.gmra.mxu0 %vm84_vm0, %v979_v48  ;;  %1618 = vmatpush3.msra.mxu1 %v1100_v1 }
  0xd9   :  { %1619 = vmatprep.subr.mxu1 %v1099_v2 }
  0xda   :  { %1620 = vmatpush3.msra.mxu1 %v1099_v2 }
  0xdb   :  { %1621 = vmatprep.subr.mxu1 %v1098_v3 }
  0xdc   :  { %1622 = vmatpush3.msra.mxu1 %v1098_v3 }
  0xdd   :  { %1623 = vmatprep.subr.mxu1 %v1097_v4 }
  0xde   :  { %1624 = vmatpush3.msra.mxu1 %v1097_v4 }
  0xdf   :  { %1625 = vmatprep.subr.mxu1 %v1096_v5 }
  0xe0   :  { %1626 = vmatpush3.msra.mxu1 %v1096_v5  ;;  %v1275_v5 = vld [vmem:[%s1933_s2] ss:$0 sm:$0xff] }
  0xe1   :  { %1627 = vmatprep.subr.mxu1 %v1095_v6 }
  0xe2   :  { %1628 = vmatpush3.msra.mxu1 %v1095_v6 }
  0xe3   :  { %1629 = vmatprep.subr.mxu1 %v1094_v7 }
  0xe4   :  { %1630 = vmatpush3.msra.mxu1 %v1094_v7 }
  0xe5   :  { %1631 = vmatprep.subr.mxu1 %v1093_v8 }
  0xe6   :  { %1632 = vmatpush3.msra.mxu1 %v1093_v8 }
  0xe7   :  { %1633 = vmatprep.subr.mxu1 %v1092_v9 }
  0xe8   :  { %1634 = vmatpush3.msra.mxu1 %v1092_v9 }
  0xf4   :  { %v1445_v12 = vpop.f32.mrf.mxu1 }
  0xf6   :  { %v252_v14 = vpop.f32.mrf.mxu1 }
  0xf8   :  { %v1448_v16 = vpop.f32.mrf.mxu1 }
  0xfa   :  { %v262_v18 = vpop.f32.mrf.mxu1 }
 0x10b   :  { %v1489_v20 = vpop.f32.mrf.mxu1 }
 0x10d   :  { %v481_v22 = vpop.f32.mrf.mxu1 }
 0x10f   :  { %v1492_v24 = vpop.f32.mrf.mxu1 }
 0x111   :  { %v491_v26 = vpop.f32.mrf.mxu1 }
 0x154   :  { %v1423_v10 = vpop.f32.mrf.mxu0 }
 0x155   :  { %v258_v31 = vadd.f32 %v1445_v12, %v1423_v10 }
 0x156   :  { %v159_v11 = vpop.f32.mrf.mxu0 }
 0x157   :  { %v253_v32 = vadd.f32 %v252_v14, %v159_v11 }
 0x158   :  { %v1426_v13 = vpop.f32.mrf.mxu0 }
 0x159   :  { %v268_v36 = vadd.f32 %v1448_v16, %v1426_v13 }
 0x15a   :  { %v169_v15 = vpop.f32.mrf.mxu0 }
 0x15b   :  { %v263_v41 = vadd.f32 %v262_v18, %v169_v15 }
 0x164   :  { %v1467_v17 = vpop.f32.mrf.mxu0 }
 0x165   :  { %v382_v33 = vadd.f32 %v1467_v17, %v258_v31 }
 0x166   :  { %v362_v19 = vpop.f32.mrf.mxu0 }
 0x167   :  { %v381_v37 = vadd.f32 %v362_v19, %v253_v32  ;;  %v501_v42 = vadd.f32 %v1489_v20, %v382_v33 }
 0x168   :  { %v1470_v21 = vpop.f32.mrf.mxu0 }
 0x169   :  { %v384_v43 = vadd.f32 %v1470_v21, %v268_v36  ;;  %v500_v45 = vadd.f32 %v481_v22, %v381_v37 }
 0x16a   :  { %v372_v23 = vpop.f32.mrf.mxu0 }
 0x16b   :  { %v1533_v28 = vpop.f32.mrf.mxu1  ;;  %v383_v46 = vadd.f32 %v372_v23, %v263_v41  ;;  %v503_v52 = vadd.f32 %v1492_v24, %v384_v43  ;;  %v1276_v43 = vld [vmem:[%s1935_s4] ss:$0 sm:$0xff] }
 0x16d   :  { %v709_v30 = vpop.f32.mrf.mxu1  ;;  %v502_v39 = vadd.f32 %v491_v26, %v383_v46 }
 0x170   :  { %v1536_v35 = vpop.f32.mrf.mxu1 }
 0x172   :  { %v719_v44 = vpop.f32.mrf.mxu1 }
 0x174   :  { %v1511_v25 = vpop.f32.mrf.mxu0 }
 0x175   :  { %v615_v49 = vadd.f32 %v1511_v25, %v501_v42 }
 0x176   :  { %v595_v27 = vpop.f32.mrf.mxu0 }
 0x177   :  { %v614_v53 = vadd.f32 %v595_v27, %v500_v45  ;;  %v729_v54 = vadd.f32 %v1533_v28, %v615_v49 }
 0x178   :  { %v1514_v29 = vpop.f32.mrf.mxu0 }
 0x179   :  { %v617_v55 = vadd.f32 %v1514_v29, %v503_v52  ;;  %v728_v56 = vadd.f32 %v709_v30, %v614_v53 }
 0x17a   :  { %v605_v34 = vpop.f32.mrf.mxu0 }
 0x17b   :  { %v616_v57 = vadd.f32 %v605_v34, %v502_v39  ;;  %v731_v58 = vadd.f32 %v1536_v35, %v617_v55 }
 0x17d   :  { %v730_v62 = vadd.f32 %v719_v44, %v616_v57 }
 0x182   :  { %v1577_v51 = vpop.f32.mrf.mxu1 }
 0x184   :  { %v1555_v38 = vpop.f32.mrf.mxu0  ;;  %v940_v47 = vpop.f32.mrf.mxu1 }
 0x185   :  { %v846_v48 = vadd.f32 %v1555_v38, %v729_v54 }
 0x186   :  { %v826_v50 = vpop.f32.mrf.mxu0  ;;  %v1580_v61 = vpop.f32.mrf.mxu1 }
 0x187   :  { %v845_v59 = vadd.f32 %v826_v50, %v728_v56  ;;  %v960_v63 = vadd.f32 %v1577_v51, %v846_v48 }
 0x188   :  { %v1558_v40 = vpop.f32.mrf.mxu0  ;;  %v950_v6 = vpop.f32.mrf.mxu1 }
 0x189   :  { %v848_v0 = vadd.f32 %v1558_v40, %v731_v58  ;;  %v959_v2 = vadd.f32 %v940_v47, %v845_v59 }
 0x18a   :  { %v836_v60 = vpop.f32.mrf.mxu0 }
 0x18b   :  { %v847_v3 = vadd.f32 %v836_v60, %v730_v62  ;;  %v962_v8 = vadd.f32 %v1580_v61, %v848_v0 }
 0x18d   :  { %v961_v12 = vadd.f32 %v950_v6, %v847_v3 }
 0x194   :  { %v1599_v1 = vpop.f32.mrf.mxu0 }
 0x195   :  { %v1074_v4 = vadd.f32 %v1599_v1, %v960_v63 }
 0x196   :  { %v1054_v7 = vpop.f32.mrf.mxu0 }
 0x197   :  { %v1073_v9 = vadd.f32 %v1054_v7, %v959_v2  ;;  %v1085_v10 = vadd.f32 %v1275_v5, %v1074_v4 }
 0x198   :  { %v1602_v11 = vpop.f32.mrf.mxu0 }
 0x199   :  { %v1084_v13 = vadd.f32 %v1275_v5, %v1073_v9  ;;  %v1076_v14 = vadd.f32 %v1602_v11, %v962_v8  ;;  %v1089_v18 = vmax.f32 %v1085_v10, 0.0 }
 0x19a   :  { %v1064_v15 = vpop.f32.mrf.mxu0 }
 0x19b   :  { %v1088_v16 = vmax.f32 %v1084_v13, 0.0  ;;  %v1075_v17 = vadd.f32 %v1064_v15, %v961_v12  ;;  %v1087_v19 = vadd.f32 %v1275_v5, %v1076_v14 }
 0x19d   :  { %v1086_v20 = vadd.f32 %v1275_v5, %v1075_v17  ;;  %1635 = vmatprep.mubr.f32.mxu1 %v1088_v16  ;;  %v1091_v22 = vmax.f32 %v1087_v19, 0.0 }
 0x19e   :  { %1636 = vmatmul.mubr.f32.vlgmr.msra.gmra.mxu1 %v1089_v18 }
 0x19f   :  { %v1090_v21 = vmax.f32 %v1086_v20, 0.0 }
 0x1a1   :  { %1638 = vmatprep.mubr.f32.mxu1 %v1090_v21 }
 0x1a2   :  { %1639 = vmatmul.mubr.f32.gmra.mxu1 %v1091_v22 }
 0x25e   :  { %v1637_v23 = vpop.f32.mrf.mxu1 }
 0x260   :  { %v1174_v24 = vpop.f32.mrf.mxu1 }
 0x261   :  { %v1193_v25 = vadd.f32 %v1637_v23, %v1174_v24 }
 0x262   :  { %v1640_v26 = vpop.f32.mrf.mxu1 }
 0x263   :  { %v1194_v27 = vrot.slane %v1193_v25, 4 }
 0x264   :  { %v1184_v28 = vpop.f32.mrf.mxu1 }
 0x265   :  { %v1195_v29 = vadd.f32 %v1194_v27, %v1193_v25  ;;  %v1200_v30 = vadd.f32 %v1640_v26, %v1184_v28 }
 0x267   :  { %v1196_v31 = vrot.slane %v1195_v29, 2  ;;  %v1201_v32 = vrot.slane %v1200_v30, 4 }
 0x269   :  { %v1197_v33 = vadd.f32 %v1196_v31, %v1195_v29  ;;  %v1202_v34 = vadd.f32 %v1201_v32, %v1200_v30 }
 0x26b   :  { %v1203_v35 = vrot.slane %v1202_v34, 2  ;;  %v1198_v36 = vrot.slane %v1197_v33, 1 }
 0x26d   :  { %v1204_v37 = vadd.f32 %v1203_v35, %v1202_v34  ;;  %v1199_v41 = vadd.f32 %v1198_v36, %v1197_v33 }
 0x26f   :  { %v1205_v38 = vrot.slane %v1204_v37, 1  ;;  %v1214_v45 = vadd.f32 %v1276_v43, %v1199_v41 }
 0x271   :  { %v1206_v42 = vadd.f32 %v1205_v38, %v1204_v37 }
 0x273   :  { %v1215_v44 = vadd.f32 %v1276_v43, %v1206_v42 }
 0x275   :  { %v1218_v46 = vrot.slane %v1215_v44, 7 }
 0x277   :  { %v1220_v49 = vsel %vm1219_vm3, %v1218_v46, %v1214_v45 }
 0x278   :  { %1222 = vst [vmem:[#allocation7] sm:$0x3] %v1220_v49 }
 0x279   :  { %1699 = shalt.err (!%p1696_p0)
}
 0x27a   :  { %1232 = dma.vmem_to_hbm [thread:$0]  %s1230_s20, 32, %s1936_s5, [#allocation4]  }
 0x27b   :  { %1712 = dma.done.wait [#allocation4], 32  }
 0x27c   :  { %1713 = vsyncadd [#allocation4], 4294967264 }
 0x27d   :  { %1236 = vsyncpa [#allocation3], 1 }
 0x27e   :  { %1237 = vsyncpa [#allocation6], 1 }
 0x27f   :  { %1238 = vsyncpa [#allocation4], 1 }

</bundles_post_ra>
